<compile_context>
chip_gen: v7x
topology: tpu7x:2x2x1
jax: 0.10.0
libtpu: 0.0.40
codegen_flags: <defaults>
</compile_context>

<pallas_src>
import functools
import math

import jax
import jax.numpy as jnp
from jax.experimental import pallas as pl
from jax.experimental.pallas import tpu as pltpu


# ----------------------------------------------------------------------------
# pe-table construction (glue; matches the PyTorch __init__ buffer exactly)
# ----------------------------------------------------------------------------
def make_pe_table(max_len: int, d_model: int) -> jnp.ndarray:
    position = jnp.arange(max_len, dtype=jnp.float32)[:, None]          # (L, 1)
    div_term = jnp.exp(
        jnp.arange(0, d_model, 2, dtype=jnp.float32)
        * (-math.log(10000.0) / d_model)
    )                                                                    # (D/2,)
    angles = position * div_term                                         # (L, D/2)
    pe = jnp.zeros((max_len, d_model), dtype=jnp.float32)
    pe = pe.at[:, 0::2].set(jnp.sin(angles))
    pe = pe.at[:, 1::2].set(jnp.cos(angles))
    # PyTorch stores (max_len, 1, d_model); we keep (max_len, d_model) and
    # broadcast over batch in the wrapper/kernel.
    return pe


# ----------------------------------------------------------------------------
# Pallas kernels (rank-agnostic: work for (tS, B, D)+(tS, 1, D) and (tS, BD)+(tS, BD))
# ----------------------------------------------------------------------------
def _posenc_add_kernel(x_ref, pe_ref, o_ref):
    o_ref[...] = (x_ref[...] + pe_ref[...]).astype(o_ref.dtype)


def _posenc_dropout_kernel(x_ref, pe_ref, bits_ref, o_ref, *,
                           signed_threshold, scale):
    # Inverted dropout: keep with prob 1-p, scale kept values by 1/(1-p).
    # bits are uniform int32 over [-2^31, 2^31); keep iff bits >= threshold.
    y = x_ref[...] + pe_ref[...]
    keep = bits_ref[...] >= jnp.int32(signed_threshold)
    o_ref[...] = jnp.where(keep, y * scale, jnp.zeros_like(y)).astype(o_ref.dtype)


# ----------------------------------------------------------------------------
# Tiling heuristics
# ----------------------------------------------------------------------------
_LANE = 128
_SUBLANE = 8
_VMEM_STEP_BUDGET = 12 * 1024 * 1024   # per-pipeline-step bytes (x2 for double-buffering)
_VMEM_LIMIT_BYTES = 48 * 1024 * 1024   # safe on v5e/v6e (128 MiB) and v7x (64 MiB) physical
_MIN_PALLAS_ELEMS = 4096               # below this the call is pure fixed overhead


def _pick_tile_s(S, bytes_per_row, block_s=None):
    ts = block_s if block_s is not None else _VMEM_STEP_BUDGET // max(1, bytes_per_row)
    if ts >= S:
        return S
    ts = max(_SUBLANE, (ts // _SUBLANE) * _SUBLANE)   # keep 2-D blocks (8,128)-legal
    return min(ts, S)


# ----------------------------------------------------------------------------
# Wrapper
# ----------------------------------------------------------------------------
def positional_encoding(x, pe_table, *, dropout_p=0.1, deterministic=True,
                        rng=None, block_s=None, interpret=False):
    """x: (S, B, D). pe_table: (max_len, D). Returns dropout(x + pe[:S])."""
    S, B, D = x.shape
    pe_slice = pe_table[:S].astype(x.dtype)           # one dtype inside the kernel
    use_dropout = (not deterministic) and dropout_p > 0.0
    if use_dropout and rng is None:
        raise ValueError("rng key required when dropout is active")
    keep_p = 1.0 - float(dropout_p)

    # Tiny inputs: a Pallas call is 100% fixed overhead -> plain fused XLA.
    if S * B * D < _MIN_PALLAS_ELEMS:
        y = x + pe_slice[:, None, :]
        if not use_dropout:
            return y
        keep = jax.random.bernoulli(rng, keep_p, y.shape)
        return jnp.where(keep, y * (1.0 / keep_p), 0).astype(x.dtype)

    itemsize = jnp.dtype(x.dtype).itemsize
    fold = (D % _LANE) != 0   # fold batch into lanes when d_model isn't lane-aligned

    if fold:
        xk = x.reshape(S, B * D)
        pek = jnp.tile(pe_slice, (1, B))               # (S, B*D) == broadcast of pe over batch
        pe_row_bytes = B * D * itemsize
        blk = lambda ts: (ts, B * D)
        pe_blk = blk
        idx = lambda i: (i, 0)
    else:
        xk = x
        pek = pe_slice[:, None, :]                     # (S, 1, D), broadcast over batch in-kernel
        pe_row_bytes = D * itemsize
        blk = lambda ts: (ts, B, D)
        pe_blk = lambda ts: (ts, 1, D)
        idx = lambda i: (i, 0, 0)

    bytes_per_row = 2 * B * D * itemsize + pe_row_bytes      # x tile + out tile + pe tile
    if use_dropout:
        bytes_per_row += B * D * 4                           # int32 random bits tile
    ts = _pick_tile_s(S, bytes_per_row, block_s)
    grid = (pl.cdiv(S, ts),)

    x_spec = pl.BlockSpec(blk(ts), idx)
    pe_spec = pl.BlockSpec(pe_blk(ts), idx)
    out_spec = pl.BlockSpec(blk(ts), idx)
    out_shape = jax.ShapeDtypeStruct(xk.shape, x.dtype)
    cparams = pltpu.CompilerParams(
        dimension_semantics=("parallel",),    # v7x: shard S-tiles across both TensorCores
        vmem_limit_bytes=_VMEM_LIMIT_BYTES,
    )

    if not use_dropout:
        out = pl.pallas_call(
            _posenc_add_kernel,
            grid=grid,
            in_specs=[x_spec, pe_spec],
            out_specs=out_spec,
            out_shape=out_shape,
            compiler_params=cparams,
            input_output_aliases={0: 0},      # write result over x's buffer when donatable
            interpret=interpret,
        )(xk, pek)
    else:
        # Random bits generated with plain jax.random (portable; no pltpu.prng_* needed).
        bits_u32 = jax.random.bits(rng, shape=xk.shape, dtype=jnp.uint32)
        bits = jax.lax.bitcast_convert_type(bits_u32, jnp.int32)
        # keep iff bits >= threshold, in signed-int32 domain (exact to 2^-32).
        threshold_u32 = min(int(round(float(dropout_p) * 4294967296.0)), 4294967295)
        signed_threshold = threshold_u32 - 2147483648
        kernel = functools.partial(_posenc_dropout_kernel,
                                   signed_threshold=signed_threshold,
                                   scale=1.0 / keep_p)
        bits_spec = pl.BlockSpec(blk(ts), idx)
        out = pl.pallas_call(
            kernel,
            grid=grid,
            in_specs=[x_spec, pe_spec, bits_spec],
            out_specs=out_spec,
            out_shape=out_shape,
            compiler_params=cparams,
            input_output_aliases={0: 0},
            interpret=interpret,
        )(xk, pek, bits)

    return out.reshape(S, B, D) if fold else out


# ----------------------------------------------------------------------------
# Main
# ----------------------------------------------------------------------------
if __name__ == "__main__":
    MAX_LEN = 512

    # --- Pallas path: lane-aligned d_model (D % 128 == 0) ---
    S, B, D = 128, 4, 128
    key = jax.random.PRNGKey(0)
    kx, kdrop = jax.random.split(key)
    x = jax.random.normal(kx, (S, B, D), dtype=jnp.float32)
    pe_table = make_pe_table(MAX_LEN, D)
    ref = x + pe_table[:S][:, None, :]

    # eval-mode (dropout = identity)
    out_eval = jax.block_until_ready(
        positional_encoding(x, pe_table, dropout_p=0.1, deterministic=True))
    assert out_eval.shape == (S, B, D)
    assert jnp.allclose(out_eval, ref, atol=1e-5), "eval-path mismatch"

    # eval-mode with a forced multi-step grid (exercises tiling / index maps)
    out_tiled = jax.block_until_ready(
        positional_encoding(x, pe_table, dropout_p=0.1, deterministic=True,
                            block_s=32))
    assert jnp.allclose(out_tiled, ref, atol=1e-5), "tiled eval-path mismatch"

    # training-mode (inverted dropout)
    out_train = jax.block_until_ready(
        positional_encoding(x, pe_table, dropout_p=0.1, deterministic=False,
                            rng=kdrop, block_s=32))
    assert out_train.shape == (S, B, D)
    scaled_ref = ref / 0.9
    mask = out_train != 0
    assert jnp.allclose(jnp.where(mask, out_train, scaled_ref), scaled_ref,
                        atol=1e-4), "dropout-path mismatch"
    keep_frac = float(jnp.mean(mask.astype(jnp.float32)))
    assert 0.8 < keep_frac < 0.98, "dropout keep fraction off"

    # --- Pallas path with lane-fold: d_model not a multiple of 128 ---
    S2, B2, D2 = 64, 8, 96
    x2 = jax.random.normal(jax.random.PRNGKey(2), (S2, B2, D2), dtype=jnp.float32)
    pe2 = make_pe_table(MAX_LEN, D2)
    out2 = jax.block_until_ready(
        positional_encoding(x2, pe2, dropout_p=0.1, deterministic=True))
    assert jnp.allclose(out2, x2 + pe2[:S2][:, None, :], atol=1e-5), \
        "fold-path mismatch"

    # --- Tiny-input bypass (pure XLA fallback) ---
    S3, B3, D3 = 8, 2, 32
    x3 = jax.random.normal(jax.random.PRNGKey(3), (S3, B3, D3), dtype=jnp.float32)
    pe3 = make_pe_table(64, D3)
    out3 = jax.block_until_ready(
        positional_encoding(x3, pe3, dropout_p=0.1, deterministic=True))
    assert jnp.allclose(out3, x3 + pe3[:S3][:, None, :], atol=1e-6), \
        "bypass mismatch"

    print("KERNEL_OK")
</pallas_src>

<mosaic_0001>
module attributes {stable_mosaic.version = 11 : i64} {
  func.func @_posenc_add_kernel(%arg0: i32, %arg1: memref<128x4x128xf32, #tpu.memory_space<vmem>>, %arg2: memref<128x1x128xf32, #tpu.memory_space<vmem>>, %arg3: memref<128x4x128xf32, #tpu.memory_space<vmem>>) attributes {dimension_semantics = [#tpu.dimension_semantics<parallel>], iteration_bounds = array<i64: 1>, scalar_prefetch = 0 : i64, scratch_operands = 0 : i64, tpu.core_type = #tpu.core_type<tc>, window_params = [{transform_indices = @transform_0, window_bounds = array<i64: 128, 4, 128>}, {transform_indices = @transform_1, window_bounds = array<i64: 128, 1, 128>}, {transform_indices = @transform_2, window_bounds = array<i64: 128, 4, 128>}]} {
    %c0 = arith.constant 0 : index
    %c0_0 = arith.constant 0 : index
    %c0_1 = arith.constant 0 : index
    %0 = vector.load %arg1[%c0, %c0_0, %c0_1] : memref<128x4x128xf32, #tpu.memory_space<vmem>>, vector<128x4x128xf32>
    %c0_2 = arith.constant 0 : index
    %c0_3 = arith.constant 0 : index
    %c0_4 = arith.constant 0 : index
    %1 = vector.load %arg2[%c0_2, %c0_3, %c0_4] : memref<128x1x128xf32, #tpu.memory_space<vmem>>, vector<128x1x128xf32>
    %2 = vector.broadcast %1 : vector<128x1x128xf32> to vector<128x4x128xf32>
    %3 = arith.addf %0, %2 : vector<128x4x128xf32>
    %c0_5 = arith.constant 0 : index
    %c0_6 = arith.constant 0 : index
    %c0_7 = arith.constant 0 : index
    %4 = vector.load %arg3[%c0_5, %c0_6, %c0_7] : memref<128x4x128xf32, #tpu.memory_space<vmem>>, vector<128x4x128xf32>
    tpu.vector_store %arg3[%c0_5, %c0_6, %c0_7], %3 {strides = array<i32>} : memref<128x4x128xf32, #tpu.memory_space<vmem>>, vector<128x4x128xf32>,
    return
  }
  func.func @transform_0(%arg0: i32) -> (i32, i32, i32) {
    %c0_i32 = arith.constant 0 : i32
    %c0_i32_0 = arith.constant 0 : i32
    %c0_i32_1 = arith.constant 0 : i32
    return %arg0, %c0_i32, %c0_i32_0 : i32, i32, i32
  }
  func.func @transform_1(%arg0: i32) -> (i32, i32, i32) {
    %c0_i32 = arith.constant 0 : i32
    %c0_i32_0 = arith.constant 0 : i32
    %c0_i32_1 = arith.constant 0 : i32
    return %arg0, %c0_i32, %c0_i32_0 : i32, i32, i32
  }
  func.func @transform_2(%arg0: i32) -> (i32, i32, i32) {
    %c0_i32 = arith.constant 0 : i32
    %c0_i32_0 = arith.constant 0 : i32
    %c0_i32_1 = arith.constant 0 : i32
    return %arg0, %c0_i32, %c0_i32_0 : i32, i32, i32
  }
}

</mosaic_0001>

<bundles_post_ra>
// kernel: tpu_custom_call.1
= control target key start
LH: loop header
LB: loop body
LE: loop exit
PB: predicated region body
PF: predicated region fallthrough
CT: control target
= control target key end

     0   :  { %7 = vsyncpa [#allocation3], 0  ;;  %s1939_s0 = inlined_call_operand.hbm [shape: f32[128,4,128], index: 0, kind: input, shape index: {}, may-alias: {0,2}]   ;;  %s1940_s1 = inlined_call_operand.vmem [shape: f32[128,1,128], index: 1, kind: input, shape index: {}]   ;;  %s1941_s2 = inlined_call_operand.hbm [shape: f32[128,4,128], index: 2, kind: output, shape index: {}, may-alias: {0,2}]  }
   0x1   :  { %8 = vsyncpa [#allocation4], 0  ;;  %s1503_s9 = smov [#allocation2]   ;;  %s1455_s13 = scalar_lea.hbm %s1939_s0, 8192 }
   0x2   :  { %s14_s10 = sshll.u32 %s1503_s9, 4  ;;  %p1456_p0 = scmp.ne.s32.totalorder %s1939_s0, %s1455_s13  ;;  %s15_s10 = int_to_ptr.vmem [resolvable:$true] %s14_s10 }
   0x3   :  { %p1459_p1 = scmp.lt.u32.totalorder %s1455_s13, %s1939_s0 }
   0x5   :  { %p1461_p2 = pnand %p1459_p1, %p1456_p0 }
   0x7   :  { %1464 = shalt.err (!%p1461_p2)
}
   0x8   :  { %s1465_s18 = scalar_lea.vmem %s15_s10, 8192  ;;  %p1470_p4 = scmp.lt.s32.totalorder %s15_s10, %s15_s10 }
   0x9   :  { %p1466_p3 = scmp.ne.s32.totalorder %s15_s10, %s1465_s18  ;;  %p1471_p5 = scmp.lt.s32.totalorder %s1465_s18, %s1465_s18 }
   0xb   :  { %p1472_p6 = por %p1471_p5, %p1470_p4 }
   0xd   :  { %p1473_p7 = pnand %p1472_p6, %p1466_p3 }
   0xf   :  { %1476 = shalt.err (!%p1473_p7)
}
  0x10   :  { %s1504_s19 = smov 64   ;;  %s1505_s20 = smov 4  }
  0x11   :  { %20 = dma.hbm_to_vmem [thread:$0]  %s1939_s0, 8192, %s15_s10, [#allocation3], %s1504_s19, %s1504_s19, %s1505_s20  }
  0x12   :  { %1499 = dma.done.wait [#allocation3], 8192  }
  0x13   :  { %1500 = vsyncadd [#allocation3], 4294959104  ;;  %s1506_s23 = smov [#allocation5]   ;;  %v26_v0 = vld [vmem:[#allocation2] sm:$0xf] }
  0x14   :  { %s1537_s24 = sshll.u32 %s1506_s23, 4  ;;  %v1323_v1 = vld [vmem:[%s1940_s1] ss:$0 sm:$0xff]  ;;  %v27_v2 = vld [vmem:[#allocation2 + $0x4] sm:$0xf]  ;;  %s1312_s24 = int_to_ptr.vmem [resolvable:$true] %s1537_s24 }
  0x15   :  { %v1050_v3 = vadd.f32 %v1323_v1, %v26_v0  ;;  %v1324_v4 = vld [vmem:[%s1940_s1 + $0x1] ss:$0 sm:$0xff]  ;;  %v28_v5 = vld [vmem:[#allocation2 + $0x8] sm:$0xf]  ;;  %v1325_v6 = vld [vmem:[%s1940_s1 + $0x2] ss:$0 sm:$0xff]  ;;  %p1482_p9 = scmp.lt.s32.totalorder %s1312_s24, %s1312_s24 }
  0x16   :  { %v1051_v7 = vadd.f32 %v1324_v4, %v27_v2  ;;  %v1052_v8 = vadd.f32 %v1325_v6, %v28_v5  ;;  %v29_v9 = vld [vmem:[#allocation2 + $0xc] sm:$0xf]  ;;  %v1326_v10 = vld [vmem:[%s1940_s1 + $0x3] ss:$0 sm:$0xff]  ;;  %v30_v11 = vld [vmem:[#allocation2 + $0x10] sm:$0xf] }
  0x17   :  { %1178 = vst [vmem:[#allocation5] sm:$0xf] %v1050_v3  ;;  %v1053_v12 = vadd.f32 %v1326_v10, %v29_v9  ;;  %v1327_v13 = vld [vmem:[%s1940_s1 + $0x4] ss:$0 sm:$0xff]  ;;  %v31_v14 = vld [vmem:[#allocation2 + $0x14] sm:$0xf] }
  0x18   :  { %v1328_v15 = vld [vmem:[%s1940_s1 + $0x5] ss:$0 sm:$0xff]  ;;  %1179 = vst [vmem:[#allocation5 + $0x4] sm:$0xf] %v1051_v7  ;;  %1180 = vst [vmem:[#allocation5 + $0x8] sm:$0xf] %v1052_v8  ;;  %v1054_v16 = vadd.f32 %v1327_v13, %v30_v11 }
  0x19   :  { %v1055_v17 = vadd.f32 %v1328_v15, %v31_v14  ;;  %v32_v18 = vld [vmem:[#allocation2 + $0x18] sm:$0xf]  ;;  %v1329_v19 = vld [vmem:[%s1940_s1 + $0x6] ss:$0 sm:$0xff]  ;;  %v33_v20 = vld [vmem:[#allocation2 + $0x1c] sm:$0xf] }
  0x1a   :  { %1181 = vst [vmem:[#allocation5 + $0xc] sm:$0xf] %v1053_v12  ;;  %v1056_v21 = vadd.f32 %v1329_v19, %v32_v18  ;;  %v1330_v22 = vld [vmem:[%s1940_s1 + $0x7] ss:$0 sm:$0xff]  ;;  %v34_v23 = vld [vmem:[#allocation2 + $0x20] sm:$0xf] }
  0x1b   :  { %v1331_v24 = vld [vmem:[%s1940_s1 + $0x8] ss:$0 sm:$0xff]  ;;  %1182 = vst [vmem:[#allocation5 + $0x10] sm:$0xf] %v1054_v16  ;;  %1183 = vst [vmem:[#allocation5 + $0x14] sm:$0xf] %v1055_v17  ;;  %v1057_v25 = vadd.f32 %v1330_v22, %v33_v20 }
  0x1c   :  { %v1058_v26 = vadd.f32 %v1331_v24, %v34_v23  ;;  %v35_v27 = vld [vmem:[#allocation2 + $0x24] sm:$0xf]  ;;  %v1332_v28 = vld [vmem:[%s1940_s1 + $0x9] ss:$0 sm:$0xff]  ;;  %1184 = vst [vmem:[#allocation5 + $0x18] sm:$0xf] %v1056_v21 }
  0x1d   :  { %v36_v29 = vld [vmem:[#allocation2 + $0x28] sm:$0xf]  ;;  %v1059_v30 = vadd.f32 %v1332_v28, %v35_v27  ;;  %v37_v32 = vld [vmem:[#allocation2 + $0x2c] sm:$0xf]  ;;  %1185 = vst [vmem:[#allocation5 + $0x1c] sm:$0xf] %v1057_v25 }
  0x1e   :  { %v1333_v31 = vld [vmem:[%s1940_s1 + $0xa] ss:$0 sm:$0xff]  ;;  %v1334_v33 = vld [vmem:[%s1940_s1 + $0xb] ss:$0 sm:$0xff]  ;;  %1186 = vst [vmem:[#allocation5 + $0x20] sm:$0xf] %v1058_v26 }
  0x1f   :  { %v1060_v34 = vadd.f32 %v1333_v31, %v36_v29  ;;  %v1061_v35 = vadd.f32 %v1334_v33, %v37_v32  ;;  %v38_v36 = vld [vmem:[#allocation2 + $0x30] sm:$0xf]  ;;  %v1335_v37 = vld [vmem:[%s1940_s1 + $0xc] ss:$0 sm:$0xff]  ;;  %v39_v38 = vld [vmem:[#allocation2 + $0x34] sm:$0xf] }
  0x20   :  { %1187 = vst [vmem:[#allocation5 + $0x24] sm:$0xf] %v1059_v30  ;;  %v1062_v39 = vadd.f32 %v1335_v37, %v38_v36  ;;  %v1336_v40 = vld [vmem:[%s1940_s1 + $0xd] ss:$0 sm:$0xff]  ;;  %v40_v41 = vld [vmem:[#allocation2 + $0x38] sm:$0xf] }
  0x21   :  { %v1337_v42 = vld [vmem:[%s1940_s1 + $0xe] ss:$0 sm:$0xff]  ;;  %1188 = vst [vmem:[#allocation5 + $0x28] sm:$0xf] %v1060_v34  ;;  %1189 = vst [vmem:[#allocation5 + $0x2c] sm:$0xf] %v1061_v35  ;;  %v1063_v43 = vadd.f32 %v1336_v40, %v39_v38 }
  0x22   :  { %v1064_v44 = vadd.f32 %v1337_v42, %v40_v41  ;;  %v41_v45 = vld [vmem:[#allocation2 + $0x3c] sm:$0xf]  ;;  %v1338_v46 = vld [vmem:[%s1940_s1 + $0xf] ss:$0 sm:$0xff]  ;;  %v42_v47 = vld [vmem:[#allocation2 + $0x40] sm:$0xf] }
  0x23   :  { %1190 = vst [vmem:[#allocation5 + $0x30] sm:$0xf] %v1062_v39  ;;  %v1065_v48 = vadd.f32 %v1338_v46, %v41_v45  ;;  %v1339_v49 = vld [vmem:[%s1940_s1 + $0x10] ss:$0 sm:$0xff]  ;;  %v43_v50 = vld [vmem:[#allocation2 + $0x44] sm:$0xf] }
  0x24   :  { %v1340_v51 = vld [vmem:[%s1940_s1 + $0x11] ss:$0 sm:$0xff]  ;;  %1191 = vst [vmem:[#allocation5 + $0x34] sm:$0xf] %v1063_v43  ;;  %1192 = vst [vmem:[#allocation5 + $0x38] sm:$0xf] %v1064_v44  ;;  %v1066_v52 = vadd.f32 %v1339_v49, %v42_v47 }
  0x25   :  { %v1067_v53 = vadd.f32 %v1340_v51, %v43_v50  ;;  %v44_v54 = vld [vmem:[#allocation2 + $0x48] sm:$0xf]  ;;  %v1341_v55 = vld [vmem:[%s1940_s1 + $0x12] ss:$0 sm:$0xff]  ;;  %v45_v56 = vld [vmem:[#allocation2 + $0x4c] sm:$0xf] }
  0x26   :  { %1193 = vst [vmem:[#allocation5 + $0x3c] sm:$0xf] %v1065_v48  ;;  %v1068_v57 = vadd.f32 %v1341_v55, %v44_v54  ;;  %v1342_v58 = vld [vmem:[%s1940_s1 + $0x13] ss:$0 sm:$0xff]  ;;  %v1343_v60 = vld [vmem:[%s1940_s1 + $0x14] ss:$0 sm:$0xff] }
  0x27   :  { %v46_v59 = vld [vmem:[#allocation2 + $0x50] sm:$0xf]  ;;  %1194 = vst [vmem:[#allocation5 + $0x40] sm:$0xf] %v1066_v52  ;;  %1195 = vst [vmem:[#allocation5 + $0x44] sm:$0xf] %v1067_v53  ;;  %v1069_v61 = vadd.f32 %v1342_v58, %v45_v56 }
  0x28   :  { %v1070_v62 = vadd.f32 %v1343_v60, %v46_v59  ;;  %v47_v63 = vld [vmem:[#allocation2 + $0x54] sm:$0xf]  ;;  %v48_v1 = vld [vmem:[#allocation2 + $0x58] sm:$0xf]  ;;  %1196 = vst [vmem:[#allocation5 + $0x48] sm:$0xf] %v1068_v57 }
  0x29   :  { %v1344_v0 = vld [vmem:[%s1940_s1 + $0x15] ss:$0 sm:$0xff]  ;;  %v1345_v3 = vld [vmem:[%s1940_s1 + $0x16] ss:$0 sm:$0xff]  ;;  %v49_v4 = vld [vmem:[#allocation2 + $0x5c] sm:$0xf] }
  0x2a   :  { %v1071_v2 = vadd.f32 %v1344_v0, %v47_v63  ;;  %v1346_v5 = vld [vmem:[%s1940_s1 + $0x17] ss:$0 sm:$0xff]  ;;  %1197 = vst [vmem:[#allocation5 + $0x4c] sm:$0xf] %v1069_v61  ;;  %1198 = vst [vmem:[#allocation5 + $0x50] sm:$0xf] %v1070_v62  ;;  %v1072_v6 = vadd.f32 %v1345_v3, %v48_v1 }
  0x2b   :  { %v1073_v7 = vadd.f32 %v1346_v5, %v49_v4  ;;  %v50_v8 = vld [vmem:[#allocation2 + $0x60] sm:$0xf]  ;;  %v1347_v9 = vld [vmem:[%s1940_s1 + $0x18] ss:$0 sm:$0xff]  ;;  %v51_v10 = vld [vmem:[#allocation2 + $0x64] sm:$0xf] }
  0x2c   :  { %1199 = vst [vmem:[#allocation5 + $0x54] sm:$0xf] %v1071_v2  ;;  %v1074_v11 = vadd.f32 %v1347_v9, %v50_v8  ;;  %v1348_v12 = vld [vmem:[%s1940_s1 + $0x19] ss:$0 sm:$0xff]  ;;  %v52_v13 = vld [vmem:[#allocation2 + $0x68] sm:$0xf] }
  0x2d   :  { %v1349_v14 = vld [vmem:[%s1940_s1 + $0x1a] ss:$0 sm:$0xff]  ;;  %1200 = vst [vmem:[#allocation5 + $0x58] sm:$0xf] %v1072_v6  ;;  %1201 = vst [vmem:[#allocation5 + $0x5c] sm:$0xf] %v1073_v7  ;;  %v1075_v15 = vadd.f32 %v1348_v12, %v51_v10 }
  0x2e   :  { %v1076_v16 = vadd.f32 %v1349_v14, %v52_v13  ;;  %v53_v17 = vld [vmem:[#allocation2 + $0x6c] sm:$0xf]  ;;  %v1350_v18 = vld [vmem:[%s1940_s1 + $0x1b] ss:$0 sm:$0xff]  ;;  %v54_v19 = vld [vmem:[#allocation2 + $0x70] sm:$0xf] }
  0x2f   :  { %1202 = vst [vmem:[#allocation5 + $0x60] sm:$0xf] %v1074_v11  ;;  %v1077_v20 = vadd.f32 %v1350_v18, %v53_v17  ;;  %v1351_v21 = vld [vmem:[%s1940_s1 + $0x1c] ss:$0 sm:$0xff]  ;;  %v55_v22 = vld [vmem:[#allocation2 + $0x74] sm:$0xf] }
  0x30   :  { %v1352_v23 = vld [vmem:[%s1940_s1 + $0x1d] ss:$0 sm:$0xff]  ;;  %1203 = vst [vmem:[#allocation5 + $0x64] sm:$0xf] %v1075_v15  ;;  %1204 = vst [vmem:[#allocation5 + $0x68] sm:$0xf] %v1076_v16  ;;  %v1078_v24 = vadd.f32 %v1351_v21, %v54_v19 }
  0x31   :  { %v1079_v25 = vadd.f32 %v1352_v23, %v55_v22  ;;  %v56_v26 = vld [vmem:[#allocation2 + $0x78] sm:$0xf]  ;;  %v1353_v27 = vld [vmem:[%s1940_s1 + $0x1e] ss:$0 sm:$0xff]  ;;  %1205 = vst [vmem:[#allocation5 + $0x6c] sm:$0xf] %v1077_v20 }
  0x32   :  { %v57_v28 = vld [vmem:[#allocation2 + $0x7c] sm:$0xf]  ;;  %v1080_v29 = vadd.f32 %v1353_v27, %v56_v26  ;;  %v58_v31 = vld [vmem:[#allocation2 + $0x80] sm:$0xf]  ;;  %1206 = vst [vmem:[#allocation5 + $0x70] sm:$0xf] %v1078_v24 }
  0x33   :  { %v1354_v30 = vld [vmem:[%s1940_s1 + $0x1f] ss:$0 sm:$0xff]  ;;  %v1355_v32 = vld [vmem:[%s1940_s1 + $0x20] ss:$0 sm:$0xff]  ;;  %1207 = vst [vmem:[#allocation5 + $0x74] sm:$0xf] %v1079_v25 }
  0x34   :  { %v1081_v33 = vadd.f32 %v1354_v30, %v57_v28  ;;  %v1082_v34 = vadd.f32 %v1355_v32, %v58_v31  ;;  %v59_v35 = vld [vmem:[#allocation2 + $0x84] sm:$0xf]  ;;  %v1356_v36 = vld [vmem:[%s1940_s1 + $0x21] ss:$0 sm:$0xff]  ;;  %v60_v37 = vld [vmem:[#allocation2 + $0x88] sm:$0xf] }
  0x35   :  { %1208 = vst [vmem:[#allocation5 + $0x78] sm:$0xf] %v1080_v29  ;;  %v1083_v38 = vadd.f32 %v1356_v36, %v59_v35  ;;  %v1357_v39 = vld [vmem:[%s1940_s1 + $0x22] ss:$0 sm:$0xff]  ;;  %v61_v40 = vld [vmem:[#allocation2 + $0x8c] sm:$0xf] }
  0x36   :  { %v1358_v41 = vld [vmem:[%s1940_s1 + $0x23] ss:$0 sm:$0xff]  ;;  %1209 = vst [vmem:[#allocation5 + $0x7c] sm:$0xf] %v1081_v33  ;;  %1210 = vst [vmem:[#allocation5 + $0x80] sm:$0xf] %v1082_v34  ;;  %v1084_v42 = vadd.f32 %v1357_v39, %v60_v37 }
  0x37   :  { %v1085_v43 = vadd.f32 %v1358_v41, %v61_v40  ;;  %v62_v44 = vld [vmem:[#allocation2 + $0x90] sm:$0xf]  ;;  %v1359_v45 = vld [vmem:[%s1940_s1 + $0x24] ss:$0 sm:$0xff]  ;;  %v63_v46 = vld [vmem:[#allocation2 + $0x94] sm:$0xf] }
  0x38   :  { %1211 = vst [vmem:[#allocation5 + $0x84] sm:$0xf] %v1083_v38  ;;  %v1086_v47 = vadd.f32 %v1359_v45, %v62_v44  ;;  %v1360_v48 = vld [vmem:[%s1940_s1 + $0x25] ss:$0 sm:$0xff]  ;;  %v64_v49 = vld [vmem:[#allocation2 + $0x98] sm:$0xf] }
  0x39   :  { %v1361_v50 = vld [vmem:[%s1940_s1 + $0x26] ss:$0 sm:$0xff]  ;;  %1212 = vst [vmem:[#allocation5 + $0x88] sm:$0xf] %v1084_v42  ;;  %1213 = vst [vmem:[#allocation5 + $0x8c] sm:$0xf] %v1085_v43  ;;  %v1087_v51 = vadd.f32 %v1360_v48, %v63_v46 }
  0x3a   :  { %v1088_v52 = vadd.f32 %v1361_v50, %v64_v49  ;;  %v65_v53 = vld [vmem:[#allocation2 + $0x9c] sm:$0xf]  ;;  %v1362_v54 = vld [vmem:[%s1940_s1 + $0x27] ss:$0 sm:$0xff]  ;;  %v66_v55 = vld [vmem:[#allocation2 + $0xa0] sm:$0xf] }
  0x3b   :  { %1214 = vst [vmem:[#allocation5 + $0x90] sm:$0xf] %v1086_v47  ;;  %v1089_v56 = vadd.f32 %v1362_v54, %v65_v53  ;;  %v1363_v57 = vld [vmem:[%s1940_s1 + $0x28] ss:$0 sm:$0xff]  ;;  %v67_v58 = vld [vmem:[#allocation2 + $0xa4] sm:$0xf] }
  0x3c   :  { %v1364_v59 = vld [vmem:[%s1940_s1 + $0x29] ss:$0 sm:$0xff]  ;;  %1215 = vst [vmem:[#allocation5 + $0x94] sm:$0xf] %v1087_v51  ;;  %1216 = vst [vmem:[#allocation5 + $0x98] sm:$0xf] %v1088_v52  ;;  %v1090_v60 = vadd.f32 %v1363_v57, %v66_v55 }
  0x3d   :  { %v1091_v61 = vadd.f32 %v1364_v59, %v67_v58  ;;  %v68_v62 = vld [vmem:[#allocation2 + $0xa8] sm:$0xf]  ;;  %v69_v0 = vld [vmem:[#allocation2 + $0xac] sm:$0xf]  ;;  %1217 = vst [vmem:[#allocation5 + $0x9c] sm:$0xf] %v1089_v56 }
  0x3e   :  { %v1365_v63 = vld [vmem:[%s1940_s1 + $0x2a] ss:$0 sm:$0xff]  ;;  %v1366_v2 = vld [vmem:[%s1940_s1 + $0x2b] ss:$0 sm:$0xff]  ;;  %v70_v3 = vld [vmem:[#allocation2 + $0xb0] sm:$0xf] }
  0x3f   :  { %v1092_v1 = vadd.f32 %v1365_v63, %v68_v62  ;;  %v1367_v4 = vld [vmem:[%s1940_s1 + $0x2c] ss:$0 sm:$0xff]  ;;  %1218 = vst [vmem:[#allocation5 + $0xa0] sm:$0xf] %v1090_v60  ;;  %1219 = vst [vmem:[#allocation5 + $0xa4] sm:$0xf] %v1091_v61  ;;  %v1093_v5 = vadd.f32 %v1366_v2, %v69_v0 }
  0x40   :  { %v1094_v6 = vadd.f32 %v1367_v4, %v70_v3  ;;  %v71_v7 = vld [vmem:[#allocation2 + $0xb4] sm:$0xf]  ;;  %v1368_v8 = vld [vmem:[%s1940_s1 + $0x2d] ss:$0 sm:$0xff]  ;;  %v72_v9 = vld [vmem:[#allocation2 + $0xb8] sm:$0xf] }
  0x41   :  { %1220 = vst [vmem:[#allocation5 + $0xa8] sm:$0xf] %v1092_v1  ;;  %v1095_v10 = vadd.f32 %v1368_v8, %v71_v7  ;;  %v1369_v11 = vld [vmem:[%s1940_s1 + $0x2e] ss:$0 sm:$0xff]  ;;  %v73_v12 = vld [vmem:[#allocation2 + $0xbc] sm:$0xf] }
  0x42   :  { %v1370_v13 = vld [vmem:[%s1940_s1 + $0x2f] ss:$0 sm:$0xff]  ;;  %1221 = vst [vmem:[#allocation5 + $0xac] sm:$0xf] %v1093_v5  ;;  %1222 = vst [vmem:[#allocation5 + $0xb0] sm:$0xf] %v1094_v6  ;;  %v1096_v14 = vadd.f32 %v1369_v11, %v72_v9 }
  0x43   :  { %v1097_v15 = vadd.f32 %v1370_v13, %v73_v12  ;;  %v74_v16 = vld [vmem:[#allocation2 + $0xc0] sm:$0xf]  ;;  %v1371_v17 = vld [vmem:[%s1940_s1 + $0x30] ss:$0 sm:$0xff]  ;;  %v75_v18 = vld [vmem:[#allocation2 + $0xc4] sm:$0xf] }
  0x44   :  { %1223 = vst [vmem:[#allocation5 + $0xb4] sm:$0xf] %v1095_v10  ;;  %v1098_v19 = vadd.f32 %v1371_v17, %v74_v16  ;;  %v1372_v20 = vld [vmem:[%s1940_s1 + $0x31] ss:$0 sm:$0xff]  ;;  %v76_v21 = vld [vmem:[#allocation2 + $0xc8] sm:$0xf] }
  0x45   :  { %v1373_v22 = vld [vmem:[%s1940_s1 + $0x32] ss:$0 sm:$0xff]  ;;  %1224 = vst [vmem:[#allocation5 + $0xb8] sm:$0xf] %v1096_v14  ;;  %1225 = vst [vmem:[#allocation5 + $0xbc] sm:$0xf] %v1097_v15  ;;  %v1099_v23 = vadd.f32 %v1372_v20, %v75_v18 }
  0x46   :  { %v1100_v24 = vadd.f32 %v1373_v22, %v76_v21  ;;  %v77_v25 = vld [vmem:[#allocation2 + $0xcc] sm:$0xf]  ;;  %v1374_v26 = vld [vmem:[%s1940_s1 + $0x33] ss:$0 sm:$0xff]  ;;  %1226 = vst [vmem:[#allocation5 + $0xc0] sm:$0xf] %v1098_v19 }
  0x47   :  { %v78_v27 = vld [vmem:[#allocation2 + $0xd0] sm:$0xf]  ;;  %v1101_v28 = vadd.f32 %v1374_v26, %v77_v25  ;;  %v1375_v29 = vld [vmem:[%s1940_s1 + $0x34] ss:$0 sm:$0xff]  ;;  %v1376_v31 = vld [vmem:[%s1940_s1 + $0x35] ss:$0 sm:$0xff] }
  0x48   :  { %v79_v30 = vld [vmem:[#allocation2 + $0xd4] sm:$0xf]  ;;  %1227 = vst [vmem:[#allocation5 + $0xc4] sm:$0xf] %v1099_v23  ;;  %1228 = vst [vmem:[#allocation5 + $0xc8] sm:$0xf] %v1100_v24  ;;  %v1102_v32 = vadd.f32 %v1375_v29, %v78_v27 }
  0x49   :  { %v1103_v33 = vadd.f32 %v1376_v31, %v79_v30  ;;  %v80_v34 = vld [vmem:[#allocation2 + $0xd8] sm:$0xf]  ;;  %v1377_v35 = vld [vmem:[%s1940_s1 + $0x36] ss:$0 sm:$0xff]  ;;  %v81_v36 = vld [vmem:[#allocation2 + $0xdc] sm:$0xf] }
  0x4a   :  { %1229 = vst [vmem:[#allocation5 + $0xcc] sm:$0xf] %v1101_v28  ;;  %v1104_v37 = vadd.f32 %v1377_v35, %v80_v34  ;;  %v1378_v38 = vld [vmem:[%s1940_s1 + $0x37] ss:$0 sm:$0xff]  ;;  %v82_v39 = vld [vmem:[#allocation2 + $0xe0] sm:$0xf] }
  0x4b   :  { %v1379_v40 = vld [vmem:[%s1940_s1 + $0x38] ss:$0 sm:$0xff]  ;;  %1230 = vst [vmem:[#allocation5 + $0xd0] sm:$0xf] %v1102_v32  ;;  %1231 = vst [vmem:[#allocation5 + $0xd4] sm:$0xf] %v1103_v33  ;;  %v1105_v41 = vadd.f32 %v1378_v38, %v81_v36 }
  0x4c   :  { %v1106_v42 = vadd.f32 %v1379_v40, %v82_v39  ;;  %v83_v43 = vld [vmem:[#allocation2 + $0xe4] sm:$0xf]  ;;  %v1380_v44 = vld [vmem:[%s1940_s1 + $0x39] ss:$0 sm:$0xff]  ;;  %v84_v45 = vld [vmem:[#allocation2 + $0xe8] sm:$0xf] }
  0x4d   :  { %1232 = vst [vmem:[#allocation5 + $0xd8] sm:$0xf] %v1104_v37  ;;  %v1107_v46 = vadd.f32 %v1380_v44, %v83_v43  ;;  %v1381_v47 = vld [vmem:[%s1940_s1 + $0x3a] ss:$0 sm:$0xff]  ;;  %v85_v48 = vld [vmem:[#allocation2 + $0xec] sm:$0xf] }
  0x4e   :  { %v1382_v49 = vld [vmem:[%s1940_s1 + $0x3b] ss:$0 sm:$0xff]  ;;  %1233 = vst [vmem:[#allocation5 + $0xdc] sm:$0xf] %v1105_v41  ;;  %1234 = vst [vmem:[#allocation5 + $0xe0] sm:$0xf] %v1106_v42  ;;  %v1108_v50 = vadd.f32 %v1381_v47, %v84_v45 }
  0x4f   :  { %v1109_v51 = vadd.f32 %v1382_v49, %v85_v48  ;;  %v86_v52 = vld [vmem:[#allocation2 + $0xf0] sm:$0xf]  ;;  %v1383_v53 = vld [vmem:[%s1940_s1 + $0x3c] ss:$0 sm:$0xff]  ;;  %v87_v54 = vld [vmem:[#allocation2 + $0xf4] sm:$0xf] }
  0x50   :  { %1235 = vst [vmem:[#allocation5 + $0xe4] sm:$0xf] %v1107_v46  ;;  %v1110_v55 = vadd.f32 %v1383_v53, %v86_v52  ;;  %v1384_v56 = vld [vmem:[%s1940_s1 + $0x3d] ss:$0 sm:$0xff]  ;;  %v88_v57 = vld [vmem:[#allocation2 + $0xf8] sm:$0xf] }
  0x51   :  { %v1385_v58 = vld [vmem:[%s1940_s1 + $0x3e] ss:$0 sm:$0xff]  ;;  %1236 = vst [vmem:[#allocation5 + $0xe8] sm:$0xf] %v1108_v50  ;;  %1237 = vst [vmem:[#allocation5 + $0xec] sm:$0xf] %v1109_v51  ;;  %v1111_v59 = vadd.f32 %v1384_v56, %v87_v54 }
  0x52   :  { %v1112_v60 = vadd.f32 %v1385_v58, %v88_v57  ;;  %v89_v61 = vld [vmem:[#allocation2 + $0xfc] sm:$0xf]  ;;  %v90_v63 = vld [vmem:[#allocation2 + $0x100] sm:$0xf]  ;;  %1238 = vst [vmem:[#allocation5 + $0xf0] sm:$0xf] %v1110_v55 }
  0x53   :  { %v1386_v62 = vld [vmem:[%s1940_s1 + $0x3f] ss:$0 sm:$0xff]  ;;  %v1387_v1 = vld [vmem:[%s1940_s1 + $0x40] ss:$0 sm:$0xff]  ;;  %v91_v2 = vld [vmem:[#allocation2 + $0x104] sm:$0xf] }
  0x54   :  { %v1113_v0 = vadd.f32 %v1386_v62, %v89_v61  ;;  %v1388_v3 = vld [vmem:[%s1940_s1 + $0x41] ss:$0 sm:$0xff]  ;;  %1239 = vst [vmem:[#allocation5 + $0xf4] sm:$0xf] %v1111_v59  ;;  %1240 = vst [vmem:[#allocation5 + $0xf8] sm:$0xf] %v1112_v60  ;;  %v1114_v4 = vadd.f32 %v1387_v1, %v90_v63 }
  0x55   :  { %v1115_v5 = vadd.f32 %v1388_v3, %v91_v2  ;;  %v92_v6 = vld [vmem:[#allocation2 + $0x108] sm:$0xf]  ;;  %v1389_v7 = vld [vmem:[%s1940_s1 + $0x42] ss:$0 sm:$0xff]  ;;  %v93_v8 = vld [vmem:[#allocation2 + $0x10c] sm:$0xf] }
  0x56   :  { %1241 = vst [vmem:[#allocation5 + $0xfc] sm:$0xf] %v1113_v0  ;;  %v1116_v9 = vadd.f32 %v1389_v7, %v92_v6  ;;  %v1390_v10 = vld [vmem:[%s1940_s1 + $0x43] ss:$0 sm:$0xff]  ;;  %v94_v11 = vld [vmem:[#allocation2 + $0x110] sm:$0xf] }
  0x57   :  { %v1391_v12 = vld [vmem:[%s1940_s1 + $0x44] ss:$0 sm:$0xff]  ;;  %1242 = vst [vmem:[#allocation5 + $0x100] sm:$0xf] %v1114_v4  ;;  %1243 = vst [vmem:[#allocation5 + $0x104] sm:$0xf] %v1115_v5  ;;  %v1117_v13 = vadd.f32 %v1390_v10, %v93_v8 }
  0x58   :  { %v1118_v14 = vadd.f32 %v1391_v12, %v94_v11  ;;  %v95_v15 = vld [vmem:[#allocation2 + $0x114] sm:$0xf]  ;;  %v1392_v16 = vld [vmem:[%s1940_s1 + $0x45] ss:$0 sm:$0xff]  ;;  %v96_v17 = vld [vmem:[#allocation2 + $0x118] sm:$0xf] }
  0x59   :  { %1244 = vst [vmem:[#allocation5 + $0x108] sm:$0xf] %v1116_v9  ;;  %v1119_v18 = vadd.f32 %v1392_v16, %v95_v15  ;;  %v1393_v19 = vld [vmem:[%s1940_s1 + $0x46] ss:$0 sm:$0xff]  ;;  %v97_v20 = vld [vmem:[#allocation2 + $0x11c] sm:$0xf] }
  0x5a   :  { %v1394_v21 = vld [vmem:[%s1940_s1 + $0x47] ss:$0 sm:$0xff]  ;;  %1245 = vst [vmem:[#allocation5 + $0x10c] sm:$0xf] %v1117_v13  ;;  %1246 = vst [vmem:[#allocation5 + $0x110] sm:$0xf] %v1118_v14  ;;  %v1120_v22 = vadd.f32 %v1393_v19, %v96_v17 }
  0x5b   :  { %v1121_v23 = vadd.f32 %v1394_v21, %v97_v20  ;;  %v98_v24 = vld [vmem:[#allocation2 + $0x120] sm:$0xf]  ;;  %v1395_v25 = vld [vmem:[%s1940_s1 + $0x48] ss:$0 sm:$0xff]  ;;  %v99_v26 = vld [vmem:[#allocation2 + $0x124] sm:$0xf] }
  0x5c   :  { %1247 = vst [vmem:[#allocation5 + $0x114] sm:$0xf] %v1119_v18  ;;  %v1122_v27 = vadd.f32 %v1395_v25, %v98_v24  ;;  %v1396_v28 = vld [vmem:[%s1940_s1 + $0x49] ss:$0 sm:$0xff]  ;;  %v1397_v30 = vld [vmem:[%s1940_s1 + $0x4a] ss:$0 sm:$0xff] }
  0x5d   :  { %v100_v29 = vld [vmem:[#allocation2 + $0x128] sm:$0xf]  ;;  %1248 = vst [vmem:[#allocation5 + $0x118] sm:$0xf] %v1120_v22  ;;  %1249 = vst [vmem:[#allocation5 + $0x11c] sm:$0xf] %v1121_v23  ;;  %v1123_v31 = vadd.f32 %v1396_v28, %v99_v26 }
  0x5e   :  { %v1124_v32 = vadd.f32 %v1397_v30, %v100_v29  ;;  %v101_v33 = vld [vmem:[#allocation2 + $0x12c] sm:$0xf]  ;;  %v1398_v34 = vld [vmem:[%s1940_s1 + $0x4b] ss:$0 sm:$0xff]  ;;  %v102_v35 = vld [vmem:[#allocation2 + $0x130] sm:$0xf] }
  0x5f   :  { %1250 = vst [vmem:[#allocation5 + $0x120] sm:$0xf] %v1122_v27  ;;  %v1125_v36 = vadd.f32 %v1398_v34, %v101_v33  ;;  %v1399_v37 = vld [vmem:[%s1940_s1 + $0x4c] ss:$0 sm:$0xff]  ;;  %v103_v38 = vld [vmem:[#allocation2 + $0x134] sm:$0xf] }
  0x60   :  { %v1400_v39 = vld [vmem:[%s1940_s1 + $0x4d] ss:$0 sm:$0xff]  ;;  %1251 = vst [vmem:[#allocation5 + $0x124] sm:$0xf] %v1123_v31  ;;  %1252 = vst [vmem:[#allocation5 + $0x128] sm:$0xf] %v1124_v32  ;;  %v1126_v40 = vadd.f32 %v1399_v37, %v102_v35 }
  0x61   :  { %v1127_v41 = vadd.f32 %v1400_v39, %v103_v38  ;;  %v104_v42 = vld [vmem:[#allocation2 + $0x138] sm:$0xf]  ;;  %v1401_v43 = vld [vmem:[%s1940_s1 + $0x4e] ss:$0 sm:$0xff]  ;;  %v105_v44 = vld [vmem:[#allocation2 + $0x13c] sm:$0xf] }
  0x62   :  { %1253 = vst [vmem:[#allocation5 + $0x12c] sm:$0xf] %v1125_v36  ;;  %v1128_v45 = vadd.f32 %v1401_v43, %v104_v42  ;;  %v1402_v46 = vld [vmem:[%s1940_s1 + $0x4f] ss:$0 sm:$0xff]  ;;  %v106_v47 = vld [vmem:[#allocation2 + $0x140] sm:$0xf] }
  0x63   :  { %v1403_v48 = vld [vmem:[%s1940_s1 + $0x50] ss:$0 sm:$0xff]  ;;  %1254 = vst [vmem:[#allocation5 + $0x130] sm:$0xf] %v1126_v40  ;;  %1255 = vst [vmem:[#allocation5 + $0x134] sm:$0xf] %v1127_v41  ;;  %v1129_v49 = vadd.f32 %v1402_v46, %v105_v44 }
  0x64   :  { %v1130_v50 = vadd.f32 %v1403_v48, %v106_v47  ;;  %v107_v51 = vld [vmem:[#allocation2 + $0x144] sm:$0xf]  ;;  %v1404_v52 = vld [vmem:[%s1940_s1 + $0x51] ss:$0 sm:$0xff]  ;;  %v108_v53 = vld [vmem:[#allocation2 + $0x148] sm:$0xf] }
  0x65   :  { %1256 = vst [vmem:[#allocation5 + $0x138] sm:$0xf] %v1128_v45  ;;  %v1131_v54 = vadd.f32 %v1404_v52, %v107_v51  ;;  %v1405_v55 = vld [vmem:[%s1940_s1 + $0x52] ss:$0 sm:$0xff]  ;;  %v109_v56 = vld [vmem:[#allocation2 + $0x14c] sm:$0xf] }
  0x66   :  { %v1406_v57 = vld [vmem:[%s1940_s1 + $0x53] ss:$0 sm:$0xff]  ;;  %1257 = vst [vmem:[#allocation5 + $0x13c] sm:$0xf] %v1129_v49  ;;  %1258 = vst [vmem:[#allocation5 + $0x140] sm:$0xf] %v1130_v50  ;;  %v1132_v58 = vadd.f32 %v1405_v55, %v108_v53 }
  0x67   :  { %v1133_v59 = vadd.f32 %v1406_v57, %v109_v56  ;;  %v110_v60 = vld [vmem:[#allocation2 + $0x150] sm:$0xf]  ;;  %v1407_v61 = vld [vmem:[%s1940_s1 + $0x54] ss:$0 sm:$0xff]  ;;  %1259 = vst [vmem:[#allocation5 + $0x144] sm:$0xf] %v1131_v54 }
  0x68   :  { %v111_v62 = vld [vmem:[#allocation2 + $0x154] sm:$0xf]  ;;  %v1134_v63 = vadd.f32 %v1407_v61, %v110_v60  ;;  %v112_v1 = vld [vmem:[#allocation2 + $0x158] sm:$0xf]  ;;  %1260 = vst [vmem:[#allocation5 + $0x148] sm:$0xf] %v1132_v58 }
  0x69   :  { %v1408_v0 = vld [vmem:[%s1940_s1 + $0x55] ss:$0 sm:$0xff]  ;;  %v1409_v2 = vld [vmem:[%s1940_s1 + $0x56] ss:$0 sm:$0xff]  ;;  %1261 = vst [vmem:[#allocation5 + $0x14c] sm:$0xf] %v1133_v59 }
  0x6a   :  { %v1135_v3 = vadd.f32 %v1408_v0, %v111_v62  ;;  %v1136_v4 = vadd.f32 %v1409_v2, %v112_v1  ;;  %v113_v5 = vld [vmem:[#allocation2 + $0x15c] sm:$0xf]  ;;  %v1410_v6 = vld [vmem:[%s1940_s1 + $0x57] ss:$0 sm:$0xff]  ;;  %v114_v7 = vld [vmem:[#allocation2 + $0x160] sm:$0xf] }
  0x6b   :  { %1262 = vst [vmem:[#allocation5 + $0x150] sm:$0xf] %v1134_v63  ;;  %v1137_v8 = vadd.f32 %v1410_v6, %v113_v5  ;;  %v1411_v9 = vld [vmem:[%s1940_s1 + $0x58] ss:$0 sm:$0xff]  ;;  %v115_v10 = vld [vmem:[#allocation2 + $0x164] sm:$0xf] }
  0x6c   :  { %v1412_v11 = vld [vmem:[%s1940_s1 + $0x59] ss:$0 sm:$0xff]  ;;  %1263 = vst [vmem:[#allocation5 + $0x154] sm:$0xf] %v1135_v3  ;;  %1264 = vst [vmem:[#allocation5 + $0x158] sm:$0xf] %v1136_v4  ;;  %v1138_v12 = vadd.f32 %v1411_v9, %v114_v7 }
  0x6d   :  { %v1139_v13 = vadd.f32 %v1412_v11, %v115_v10  ;;  %v116_v14 = vld [vmem:[#allocation2 + $0x168] sm:$0xf]  ;;  %v1413_v15 = vld [vmem:[%s1940_s1 + $0x5a] ss:$0 sm:$0xff]  ;;  %v117_v16 = vld [vmem:[#allocation2 + $0x16c] sm:$0xf] }
  0x6e   :  { %1265 = vst [vmem:[#allocation5 + $0x15c] sm:$0xf] %v1137_v8  ;;  %v1140_v17 = vadd.f32 %v1413_v15, %v116_v14  ;;  %v1414_v18 = vld [vmem:[%s1940_s1 + $0x5b] ss:$0 sm:$0xff]  ;;  %v118_v19 = vld [vmem:[#allocation2 + $0x170] sm:$0xf] }
  0x6f   :  { %v1415_v20 = vld [vmem:[%s1940_s1 + $0x5c] ss:$0 sm:$0xff]  ;;  %1266 = vst [vmem:[#allocation5 + $0x160] sm:$0xf] %v1138_v12  ;;  %1267 = vst [vmem:[#allocation5 + $0x164] sm:$0xf] %v1139_v13  ;;  %v1141_v21 = vadd.f32 %v1414_v18, %v117_v16 }
  0x70   :  { %v1142_v22 = vadd.f32 %v1415_v20, %v118_v19  ;;  %v119_v23 = vld [vmem:[#allocation2 + $0x174] sm:$0xf]  ;;  %v1416_v24 = vld [vmem:[%s1940_s1 + $0x5d] ss:$0 sm:$0xff]  ;;  %v120_v25 = vld [vmem:[#allocation2 + $0x178] sm:$0xf] }
  0x71   :  { %1268 = vst [vmem:[#allocation5 + $0x168] sm:$0xf] %v1140_v17  ;;  %v1143_v26 = vadd.f32 %v1416_v24, %v119_v23  ;;  %v1417_v27 = vld [vmem:[%s1940_s1 + $0x5e] ss:$0 sm:$0xff]  ;;  %v1418_v29 = vld [vmem:[%s1940_s1 + $0x5f] ss:$0 sm:$0xff] }
  0x72   :  { %v121_v28 = vld [vmem:[#allocation2 + $0x17c] sm:$0xf]  ;;  %1269 = vst [vmem:[#allocation5 + $0x16c] sm:$0xf] %v1141_v21  ;;  %1270 = vst [vmem:[#allocation5 + $0x170] sm:$0xf] %v1142_v22  ;;  %v1144_v30 = vadd.f32 %v1417_v27, %v120_v25 }
  0x73   :  { %v1145_v31 = vadd.f32 %v1418_v29, %v121_v28  ;;  %v122_v32 = vld [vmem:[#allocation2 + $0x180] sm:$0xf]  ;;  %v123_v34 = vld [vmem:[#allocation2 + $0x184] sm:$0xf]  ;;  %1271 = vst [vmem:[#allocation5 + $0x174] sm:$0xf] %v1143_v26 }
  0x74   :  { %v1419_v33 = vld [vmem:[%s1940_s1 + $0x60] ss:$0 sm:$0xff]  ;;  %v1420_v36 = vld [vmem:[%s1940_s1 + $0x61] ss:$0 sm:$0xff]  ;;  %v124_v37 = vld [vmem:[#allocation2 + $0x188] sm:$0xf] }
  0x75   :  { %v1146_v35 = vadd.f32 %v1419_v33, %v122_v32  ;;  %v1421_v38 = vld [vmem:[%s1940_s1 + $0x62] ss:$0 sm:$0xff]  ;;  %1272 = vst [vmem:[#allocation5 + $0x178] sm:$0xf] %v1144_v30  ;;  %1273 = vst [vmem:[#allocation5 + $0x17c] sm:$0xf] %v1145_v31  ;;  %v1147_v39 = vadd.f32 %v1420_v36, %v123_v34 }
  0x76   :  { %v1148_v40 = vadd.f32 %v1421_v38, %v124_v37  ;;  %v125_v41 = vld [vmem:[#allocation2 + $0x18c] sm:$0xf]  ;;  %v1422_v42 = vld [vmem:[%s1940_s1 + $0x63] ss:$0 sm:$0xff]  ;;  %v126_v43 = vld [vmem:[#allocation2 + $0x190] sm:$0xf] }
  0x77   :  { %1274 = vst [vmem:[#allocation5 + $0x180] sm:$0xf] %v1146_v35  ;;  %v1149_v44 = vadd.f32 %v1422_v42, %v125_v41  ;;  %v1423_v45 = vld [vmem:[%s1940_s1 + $0x64] ss:$0 sm:$0xff]  ;;  %v127_v46 = vld [vmem:[#allocation2 + $0x194] sm:$0xf] }
  0x78   :  { %v1424_v47 = vld [vmem:[%s1940_s1 + $0x65] ss:$0 sm:$0xff]  ;;  %1275 = vst [vmem:[#allocation5 + $0x184] sm:$0xf] %v1147_v39  ;;  %1276 = vst [vmem:[#allocation5 + $0x188] sm:$0xf] %v1148_v40  ;;  %v1150_v48 = vadd.f32 %v1423_v45, %v126_v43 }
  0x79   :  { %v1151_v49 = vadd.f32 %v1424_v47, %v127_v46  ;;  %v128_v50 = vld [vmem:[#allocation2 + $0x198] sm:$0xf]  ;;  %v1425_v51 = vld [vmem:[%s1940_s1 + $0x66] ss:$0 sm:$0xff]  ;;  %v129_v52 = vld [vmem:[#allocation2 + $0x19c] sm:$0xf] }
  0x7a   :  { %1277 = vst [vmem:[#allocation5 + $0x18c] sm:$0xf] %v1149_v44  ;;  %v1152_v53 = vadd.f32 %v1425_v51, %v128_v50  ;;  %v1426_v54 = vld [vmem:[%s1940_s1 + $0x67] ss:$0 sm:$0xff]  ;;  %v130_v55 = vld [vmem:[#allocation2 + $0x1a0] sm:$0xf] }
  0x7b   :  { %v1427_v56 = vld [vmem:[%s1940_s1 + $0x68] ss:$0 sm:$0xff]  ;;  %1278 = vst [vmem:[#allocation5 + $0x190] sm:$0xf] %v1150_v48  ;;  %1279 = vst [vmem:[#allocation5 + $0x194] sm:$0xf] %v1151_v49  ;;  %v1153_v57 = vadd.f32 %v1426_v54, %v129_v52 }
  0x7c   :  { %v1154_v58 = vadd.f32 %v1427_v56, %v130_v55  ;;  %v131_v59 = vld [vmem:[#allocation2 + $0x1a4] sm:$0xf]  ;;  %v1428_v60 = vld [vmem:[%s1940_s1 + $0x69] ss:$0 sm:$0xff]  ;;  %1280 = vst [vmem:[#allocation5 + $0x198] sm:$0xf] %v1152_v53 }
  0x7d   :  { %v132_v61 = vld [vmem:[#allocation2 + $0x1a8] sm:$0xf]  ;;  %v1155_v62 = vadd.f32 %v1428_v60, %v131_v59  ;;  %v133_v0 = vld [vmem:[#allocation2 + $0x1ac] sm:$0xf]  ;;  %1281 = vst [vmem:[#allocation5 + $0x19c] sm:$0xf] %v1153_v57 }
  0x7e   :  { %v1429_v63 = vld [vmem:[%s1940_s1 + $0x6a] ss:$0 sm:$0xff]  ;;  %v1430_v1 = vld [vmem:[%s1940_s1 + $0x6b] ss:$0 sm:$0xff]  ;;  %1282 = vst [vmem:[#allocation5 + $0x1a0] sm:$0xf] %v1154_v58 }
  0x7f   :  { %v1156_v2 = vadd.f32 %v1429_v63, %v132_v61  ;;  %v1157_v3 = vadd.f32 %v1430_v1, %v133_v0  ;;  %v134_v4 = vld [vmem:[#allocation2 + $0x1b0] sm:$0xf]  ;;  %v1431_v5 = vld [vmem:[%s1940_s1 + $0x6c] ss:$0 sm:$0xff]  ;;  %v135_v6 = vld [vmem:[#allocation2 + $0x1b4] sm:$0xf] }
  0x80   :  { %1283 = vst [vmem:[#allocation5 + $0x1a4] sm:$0xf] %v1155_v62  ;;  %v1158_v7 = vadd.f32 %v1431_v5, %v134_v4  ;;  %v1432_v8 = vld [vmem:[%s1940_s1 + $0x6d] ss:$0 sm:$0xff]  ;;  %v136_v9 = vld [vmem:[#allocation2 + $0x1b8] sm:$0xf] }
  0x81   :  { %v1433_v10 = vld [vmem:[%s1940_s1 + $0x6e] ss:$0 sm:$0xff]  ;;  %1284 = vst [vmem:[#allocation5 + $0x1a8] sm:$0xf] %v1156_v2  ;;  %1285 = vst [vmem:[#allocation5 + $0x1ac] sm:$0xf] %v1157_v3  ;;  %v1159_v11 = vadd.f32 %v1432_v8, %v135_v6 }
  0x82   :  { %v1160_v12 = vadd.f32 %v1433_v10, %v136_v9  ;;  %v137_v13 = vld [vmem:[#allocation2 + $0x1bc] sm:$0xf]  ;;  %v1434_v14 = vld [vmem:[%s1940_s1 + $0x6f] ss:$0 sm:$0xff]  ;;  %v138_v15 = vld [vmem:[#allocation2 + $0x1c0] sm:$0xf] }
  0x83   :  { %1286 = vst [vmem:[#allocation5 + $0x1b0] sm:$0xf] %v1158_v7  ;;  %v1161_v16 = vadd.f32 %v1434_v14, %v137_v13  ;;  %v1435_v17 = vld [vmem:[%s1940_s1 + $0x70] ss:$0 sm:$0xff]  ;;  %v139_v18 = vld [vmem:[#allocation2 + $0x1c4] sm:$0xf] }
  0x84   :  { %v1436_v19 = vld [vmem:[%s1940_s1 + $0x71] ss:$0 sm:$0xff]  ;;  %1287 = vst [vmem:[#allocation5 + $0x1b4] sm:$0xf] %v1159_v11  ;;  %1288 = vst [vmem:[#allocation5 + $0x1b8] sm:$0xf] %v1160_v12  ;;  %v1162_v20 = vadd.f32 %v1435_v17, %v138_v15 }
  0x85   :  { %v1163_v21 = vadd.f32 %v1436_v19, %v139_v18  ;;  %v140_v22 = vld [vmem:[#allocation2 + $0x1c8] sm:$0xf]  ;;  %v1437_v23 = vld [vmem:[%s1940_s1 + $0x72] ss:$0 sm:$0xff]  ;;  %v141_v24 = vld [vmem:[#allocation2 + $0x1cc] sm:$0xf] }
  0x86   :  { %1289 = vst [vmem:[#allocation5 + $0x1bc] sm:$0xf] %v1161_v16  ;;  %v1164_v25 = vadd.f32 %v1437_v23, %v140_v22  ;;  %v1438_v26 = vld [vmem:[%s1940_s1 + $0x73] ss:$0 sm:$0xff]  ;;  %v1439_v28 = vld [vmem:[%s1940_s1 + $0x74] ss:$0 sm:$0xff] }
  0x87   :  { %v142_v27 = vld [vmem:[#allocation2 + $0x1d0] sm:$0xf]  ;;  %1290 = vst [vmem:[#allocation5 + $0x1c0] sm:$0xf] %v1162_v20  ;;  %1291 = vst [vmem:[#allocation5 + $0x1c4] sm:$0xf] %v1163_v21  ;;  %v1165_v29 = vadd.f32 %v1438_v26, %v141_v24 }
  0x88   :  { %v1166_v30 = vadd.f32 %v1439_v28, %v142_v27  ;;  %v143_v31 = vld [vmem:[#allocation2 + $0x1d4] sm:$0xf]  ;;  %v144_v33 = vld [vmem:[#allocation2 + $0x1d8] sm:$0xf]  ;;  %1292 = vst [vmem:[#allocation5 + $0x1c8] sm:$0xf] %v1164_v25 }
  0x89   :  { %v1440_v32 = vld [vmem:[%s1940_s1 + $0x75] ss:$0 sm:$0xff]  ;;  %v1441_v35 = vld [vmem:[%s1940_s1 + $0x76] ss:$0 sm:$0xff]  ;;  %v145_v36 = vld [vmem:[#allocation2 + $0x1dc] sm:$0xf] }
  0x8a   :  { %v1167_v34 = vadd.f32 %v1440_v32, %v143_v31  ;;  %v1442_v37 = vld [vmem:[%s1940_s1 + $0x77] ss:$0 sm:$0xff]  ;;  %1293 = vst [vmem:[#allocation5 + $0x1cc] sm:$0xf] %v1165_v29  ;;  %1294 = vst [vmem:[#allocation5 + $0x1d0] sm:$0xf] %v1166_v30  ;;  %v1168_v38 = vadd.f32 %v1441_v35, %v144_v33 }
  0x8b   :  { %v1169_v39 = vadd.f32 %v1442_v37, %v145_v36  ;;  %v146_v40 = vld [vmem:[#allocation2 + $0x1e0] sm:$0xf]  ;;  %v1443_v41 = vld [vmem:[%s1940_s1 + $0x78] ss:$0 sm:$0xff]  ;;  %v147_v42 = vld [vmem:[#allocation2 + $0x1e4] sm:$0xf] }
  0x8c   :  { %1295 = vst [vmem:[#allocation5 + $0x1d4] sm:$0xf] %v1167_v34  ;;  %v1170_v43 = vadd.f32 %v1443_v41, %v146_v40  ;;  %v1444_v44 = vld [vmem:[%s1940_s1 + $0x79] ss:$0 sm:$0xff]  ;;  %v148_v45 = vld [vmem:[#allocation2 + $0x1e8] sm:$0xf] }
  0x8d   :  { %v1445_v46 = vld [vmem:[%s1940_s1 + $0x7a] ss:$0 sm:$0xff]  ;;  %1296 = vst [vmem:[#allocation5 + $0x1d8] sm:$0xf] %v1168_v38  ;;  %1297 = vst [vmem:[#allocation5 + $0x1dc] sm:$0xf] %v1169_v39  ;;  %v1171_v47 = vadd.f32 %v1444_v44, %v147_v42 }
  0x8e   :  { %v1172_v48 = vadd.f32 %v1445_v46, %v148_v45  ;;  %v149_v49 = vld [vmem:[#allocation2 + $0x1ec] sm:$0xf]  ;;  %v1446_v50 = vld [vmem:[%s1940_s1 + $0x7b] ss:$0 sm:$0xff]  ;;  %v150_v51 = vld [vmem:[#allocation2 + $0x1f0] sm:$0xf] }
  0x8f   :  { %1298 = vst [vmem:[#allocation5 + $0x1e0] sm:$0xf] %v1170_v43  ;;  %v1173_v52 = vadd.f32 %v1446_v50, %v149_v49  ;;  %v1447_v53 = vld [vmem:[%s1940_s1 + $0x7c] ss:$0 sm:$0xff]  ;;  %v151_v54 = vld [vmem:[#allocation2 + $0x1f4] sm:$0xf] }
  0x90   :  { %v1448_v55 = vld [vmem:[%s1940_s1 + $0x7d] ss:$0 sm:$0xff]  ;;  %1299 = vst [vmem:[#allocation5 + $0x1e4] sm:$0xf] %v1171_v47  ;;  %1300 = vst [vmem:[#allocation5 + $0x1e8] sm:$0xf] %v1172_v48  ;;  %v1174_v56 = vadd.f32 %v1447_v53, %v150_v51 }
  0x91   :  { %v1175_v57 = vadd.f32 %v1448_v55, %v151_v54  ;;  %v152_v58 = vld [vmem:[#allocation2 + $0x1f8] sm:$0xf]  ;;  %v1449_v59 = vld [vmem:[%s1940_s1 + $0x7e] ss:$0 sm:$0xff]  ;;  %1301 = vst [vmem:[#allocation5 + $0x1ec] sm:$0xf] %v1173_v52 }
  0x92   :  { %v153_v60 = vld [vmem:[#allocation2 + $0x1fc] sm:$0xf]  ;;  %v1176_v61 = vadd.f32 %v1449_v59, %v152_v58  ;;  %1302 = vst [vmem:[#allocation5 + $0x1f0] sm:$0xf] %v1174_v56  ;;  %s1477_s18 = scalar_lea.vmem %s1312_s24, 8192 }
  0x93   :  { %v1450_v62 = vld [vmem:[%s1940_s1 + $0x7f] ss:$0 sm:$0xff]  ;;  %1303 = vst [vmem:[#allocation5 + $0x1f4] sm:$0xf] %v1175_v57  ;;  %p1478_p8 = scmp.ne.s32.totalorder %s1312_s24, %s1477_s18  ;;  %p1483_p10 = scmp.lt.s32.totalorder %s1477_s18, %s1477_s18 }
  0x94   :  { %v1177_v63 = vadd.f32 %v1450_v62, %v153_v60  ;;  %1304 = vst [vmem:[#allocation5 + $0x1f8] sm:$0xf] %v1176_v61 }
  0x95   :  { %p1484_p11 = por %p1483_p10, %p1482_p9 }
  0x96   :  { %1305 = vst [vmem:[#allocation5 + $0x1fc] sm:$0xf] %v1177_v63 }
  0x97   :  { %p1485_p12 = pnand %p1484_p11, %p1478_p8 }
  0x99   :  { %1488 = shalt.err (!%p1485_p12)
}
  0x9a   :  { %s1489_s23 = scalar_lea.hbm %s1941_s2, 8192 }
  0x9b   :  { %p1490_p13 = scmp.ne.s32.totalorder %s1941_s2, %s1489_s23  ;;  %p1493_p0 = scmp.lt.u32.totalorder %s1489_s23, %s1941_s2 }
  0x9d   :  { %p1495_p1 = pnand %p1493_p0, %p1490_p13 }
  0x9f   :  { %1498 = shalt.err (!%p1495_p1)
}
  0xa0   :  { %1317 = dma.vmem_to_hbm [thread:$0]  %s1312_s24, 8192, %s1941_s2, [#allocation4], %s1504_s19, %s1504_s19, %s1505_s20  }
  0xa1   :  { %1501 = dma.done.wait [#allocation4], 8192  }
  0xa2   :  { %1502 = vsyncadd [#allocation4], 4294959104 }
  0xa3   :  { %1321 = vsyncpa [#allocation3], 1 }
  0xa4   :  { %1322 = vsyncpa [#allocation4], 1 }

</bundles_post_ra>
